<compile_context>
chip_gen: v5e
topology: v5e:2x2
jax: 0.10.0
libtpu: 0.0.40
codegen_flags: <defaults>
</compile_context>

<pallas_src>
import jax
import jax.numpy as jnp
from jax.experimental import pallas as pl
from jax.experimental.pallas import tpu as pltpu


def _round_up(x: int, m: int) -> int:
    return (x + m - 1) // m * m


def node_predictor_kernel(x_ref, w1_ref, b1_ref, w2_ref, b2_ref, out_ref):
    # fc1: MXU matmul, f32 accumulation; bias + ReLU fused in the epilogue.
    h = jnp.dot(x_ref[...], w1_ref[...], preferred_element_type=jnp.float32)
    h = jnp.maximum(h + b1_ref[...], 0.0)            # stays f32 between layers
    # fc2: same pattern.
    y = jnp.dot(h, w2_ref[...], preferred_element_type=jnp.float32)
    out_ref[...] = jnp.maximum(y + b2_ref[...], 0.0).astype(out_ref.dtype)


def node_predictor(node_feat, w1, b1, w2, b2, *, tm=512):
    """Fused forward pass: relu(relu(x @ w1 + b1) @ w2 + b2).

    node_feat: [N, n_inp]
    w1: [n_inp, n_inp], b1: [1, n_inp] (or [n_inp])
    w2: [n_inp, n_classes], b2: [1, n_classes] (or [n_classes])
    """
    N, n_inp = node_feat.shape
    n_classes = w2.shape[1]
    dtype = node_feat.dtype

    # ---- Lane-dense / MXU-aligned padded problem sizes ----
    Kp = _round_up(n_inp, 128)           # hidden / contraction dim (lanes)
    Cp = _round_up(n_classes, 128)       # output classes (lanes)
    tm = max(128, _round_up(tm, 128))    # MXU-aligned row tile
    tm_eff = min(tm, _round_up(N, 256))  # don't over-pad tiny inputs
    Np = _round_up(N, tm_eff)            # padded row count (ragged-N safe)

    # ---- Zero-pad operands (padding is exactly neutral through ReLU) ----
    x_p = jnp.zeros((Np, Kp), dtype).at[:N, :n_inp].set(node_feat)
    w1_p = jnp.zeros((Kp, Kp), dtype).at[:n_inp, :n_inp].set(w1)
    b1_p = jnp.zeros((1, Kp), dtype).at[:, :n_inp].set(jnp.reshape(b1, (1, n_inp)))
    w2_p = jnp.zeros((Kp, Cp), dtype).at[:n_inp, :n_classes].set(w2)
    b2_p = jnp.zeros((1, Cp), dtype).at[:, :n_classes].set(jnp.reshape(b2, (1, n_classes)))

    grid = (Np // tm_eff,)

    # ---- VMEM budget: double-buffered x/out tiles + resident weights ----
    itemsize = jnp.dtype(dtype).itemsize
    needed = (2 * (tm_eff * Kp + tm_eff * Cp)             # pipelined row tiles
              + 2 * (Kp * Kp + Kp * Cp + Kp + Cp)         # weights + biases
              ) * itemsize + (4 << 20)                    # slack
    vmem_limit = int(min(max(needed, 32 << 20), 64 << 20))  # v7x-safe cap

    cost = pl.CostEstimate(
        flops=2 * Np * Kp * (Kp + Cp),
        transcendentals=0,
        bytes_accessed=(Np * Kp + Kp * Kp + Kp * Cp + Kp + Cp + Np * Cp) * itemsize,
    )

    out_p = pl.pallas_call(
        node_predictor_kernel,
        out_shape=jax.ShapeDtypeStruct((Np, Cp), dtype),
        grid_spec=pltpu.PrefetchScalarGridSpec(
            num_scalar_prefetch=0,
            grid=grid,
            in_specs=[
                pl.BlockSpec((tm_eff, Kp), lambda i: (i, 0)),   # x row tile
                pl.BlockSpec((Kp, Kp), lambda i: (0, 0)),       # w1 (resident)
                pl.BlockSpec((1, Kp), lambda i: (0, 0)),        # b1 (resident)
                pl.BlockSpec((Kp, Cp), lambda i: (0, 0)),       # w2 (resident)
                pl.BlockSpec((1, Cp), lambda i: (0, 0)),        # b2 (resident)
            ],
            out_specs=pl.BlockSpec((tm_eff, Cp), lambda i: (i, 0)),
        ),
        compiler_params=pltpu.CompilerParams(
            dimension_semantics=("parallel",),    # shards rows across TCs on v7x
            vmem_limit_bytes=vmem_limit),
        cost_estimate=cost,
    )(x_p, w1_p, b1_p, w2_p, b2_p)

    # Slice away row and class padding.
    return out_p[:N, :n_classes]


def init_params(key, n_inp, n_classes, dtype=jnp.float32):
    """Deterministic init mimicking PyTorch nn.Linear defaults (uniform +/- 1/sqrt(fan_in))."""
    k1, k2, k3, k4 = jax.random.split(key, 4)
    bound = 1.0 / jnp.sqrt(n_inp)
    w1 = jax.random.uniform(k1, (n_inp, n_inp), dtype, -bound, bound)
    b1 = jax.random.uniform(k2, (1, n_inp), dtype, -bound, bound)
    w2 = jax.random.uniform(k3, (n_inp, n_classes), dtype, -bound, bound)
    b2 = jax.random.uniform(k4, (1, n_classes), dtype, -bound, bound)
    return w1, b1, w2, b2


if __name__ == "__main__":
    key = jax.random.PRNGKey(0)
    k_x, k_p = jax.random.split(key)

    N, n_inp, n_classes = 8, 32, 8
    node_feat = jax.random.normal(k_x, (N, n_inp), jnp.float32)
    w1, b1, w2, b2 = init_params(k_p, n_inp, n_classes)

    out = node_predictor(node_feat, w1, b1, w2, b2)
    out = jax.block_until_ready(out)

    # Pure-JAX reference check.
    ref = jnp.maximum(jnp.maximum(node_feat @ w1 + b1, 0.0) @ w2 + b2, 0.0)
    assert out.shape == (N, n_classes)
    assert jnp.allclose(out, ref, atol=1e-5, rtol=1e-5)

    print("KERNEL_OK")
</pallas_src>

<mosaic_0001>
module attributes {stable_mosaic.version = 11 : i64} {
  func.func @node_predictor_kernel(%arg0: i32, %arg1: memref<256x128xf32, #tpu.memory_space<vmem>>, %arg2: memref<128x128xf32, #tpu.memory_space<vmem>>, %arg3: memref<1x128xf32, #tpu.memory_space<vmem>>, %arg4: memref<128x128xf32, #tpu.memory_space<vmem>>, %arg5: memref<1x128xf32, #tpu.memory_space<vmem>>, %arg6: memref<256x128xf32, #tpu.memory_space<vmem>>) attributes {dimension_semantics = [#tpu.dimension_semantics<parallel>], iteration_bounds = array<i64: 1>, scalar_prefetch = 0 : i64, scratch_operands = 0 : i64, tpu.core_type = #tpu.core_type<tc>, window_params = [{transform_indices = @transform_0, window_bounds = array<i64: 256, 128>}, {pipeline_mode = #tpu.pipeline_mode<synchronous>, transform_indices = @transform_1, window_bounds = array<i64: 128, 128>}, {pipeline_mode = #tpu.pipeline_mode<synchronous>, transform_indices = @transform_2, window_bounds = array<i64: 1, 128>}, {pipeline_mode = #tpu.pipeline_mode<synchronous>, transform_indices = @transform_3, window_bounds = array<i64: 128, 128>}, {pipeline_mode = #tpu.pipeline_mode<synchronous>, transform_indices = @transform_4, window_bounds = array<i64: 1, 128>}, {transform_indices = @transform_5, window_bounds = array<i64: 256, 128>}]} {
    %c0 = arith.constant 0 : index
    %c0_0 = arith.constant 0 : index
    %0 = vector.load %arg1[%c0, %c0_0] : memref<256x128xf32, #tpu.memory_space<vmem>>, vector<256x128xf32>
    %c0_1 = arith.constant 0 : index
    %c0_2 = arith.constant 0 : index
    %1 = vector.load %arg2[%c0_1, %c0_2] : memref<128x128xf32, #tpu.memory_space<vmem>>, vector<128x128xf32>
    %cst = arith.constant dense<0.000000e+00> : vector<256x128xf32>
    %2 = tpu.matmul %0, %1, %cst {dimension_numbers = #tpu.dot_dimension_numbers<[1], [0], [0], [1], [0, 0, 1, 1], [], []>} : vector<256x128xf32>, vector<128x128xf32>, vector<256x128xf32> -> vector<256x128xf32>
    %c0_3 = arith.constant 0 : index
    %c0_4 = arith.constant 0 : index
    %3 = vector.load %arg3[%c0_3, %c0_4] : memref<1x128xf32, #tpu.memory_space<vmem>>, vector<1x128xf32>
    %4 = vector.broadcast %3 : vector<1x128xf32> to vector<256x128xf32>
    %5 = arith.addf %2, %4 : vector<256x128xf32>
    %cst_5 = arith.constant 0.000000e+00 : f32
    %6 = vector.broadcast %cst_5 : f32 to vector<256x128xf32>
    %7 = arith.maximumf %5, %6 : vector<256x128xf32>
    %c0_6 = arith.constant 0 : index
    %c0_7 = arith.constant 0 : index
    %8 = vector.load %arg4[%c0_6, %c0_7] : memref<128x128xf32, #tpu.memory_space<vmem>>, vector<128x128xf32>
    %cst_8 = arith.constant dense<0.000000e+00> : vector<256x128xf32>
    %9 = tpu.matmul %7, %8, %cst_8 {dimension_numbers = #tpu.dot_dimension_numbers<[1], [0], [0], [1], [0, 0, 1, 1], [], []>} : vector<256x128xf32>, vector<128x128xf32>, vector<256x128xf32> -> vector<256x128xf32>
    %c0_9 = arith.constant 0 : index
    %c0_10 = arith.constant 0 : index
    %10 = vector.load %arg5[%c0_9, %c0_10] : memref<1x128xf32, #tpu.memory_space<vmem>>, vector<1x128xf32>
    %11 = vector.broadcast %10 : vector<1x128xf32> to vector<256x128xf32>
    %12 = arith.addf %9, %11 : vector<256x128xf32>
    %cst_11 = arith.constant 0.000000e+00 : f32
    %13 = vector.broadcast %cst_11 : f32 to vector<256x128xf32>
    %14 = arith.maximumf %12, %13 : vector<256x128xf32>
    %c0_12 = arith.constant 0 : index
    %c0_13 = arith.constant 0 : index
    %15 = vector.load %arg6[%c0_12, %c0_13] : memref<256x128xf32, #tpu.memory_space<vmem>>, vector<256x128xf32>
    tpu.vector_store %arg6[%c0_12, %c0_13], %14 {strides = array<i32>} : memref<256x128xf32, #tpu.memory_space<vmem>>, vector<256x128xf32>,
    return
  }
  func.func @transform_0(%arg0: i32) -> (i32, i32) {
    %c0_i32 = arith.constant 0 : i32
    %c0_i32_0 = arith.constant 0 : i32
    return %arg0, %c0_i32 : i32, i32
  }
  func.func @transform_1(%arg0: i32) -> (i32, i32) {
    %c0_i32 = arith.constant 0 : i32
    %c0_i32_0 = arith.constant 0 : i32
    %c0_i32_1 = arith.constant 0 : i32
    return %c0_i32, %c0_i32_0 : i32, i32
  }
  func.func @transform_2(%arg0: i32) -> (i32, i32) {
    %c0_i32 = arith.constant 0 : i32
    %c0_i32_0 = arith.constant 0 : i32
    %c0_i32_1 = arith.constant 0 : i32
    return %c0_i32, %c0_i32_0 : i32, i32
  }
  func.func @transform_3(%arg0: i32) -> (i32, i32) {
    %c0_i32 = arith.constant 0 : i32
    %c0_i32_0 = arith.constant 0 : i32
    %c0_i32_1 = arith.constant 0 : i32
    return %c0_i32, %c0_i32_0 : i32, i32
  }
  func.func @transform_4(%arg0: i32) -> (i32, i32) {
    %c0_i32 = arith.constant 0 : i32
    %c0_i32_0 = arith.constant 0 : i32
    %c0_i32_1 = arith.constant 0 : i32
    return %c0_i32, %c0_i32_0 : i32, i32
  }
  func.func @transform_5(%arg0: i32) -> (i32, i32) {
    %c0_i32 = arith.constant 0 : i32
    %c0_i32_0 = arith.constant 0 : i32
    return %arg0, %c0_i32 : i32, i32
  }
}

</mosaic_0001>

<bundles_post_ra>
// kernel: tpu_custom_call.1
= control target key start
LH: loop header
LB: loop body
LE: loop exit
PB: predicated region body
PF: predicated region fallthrough
CT: control target
= control target key end

     0   :  { %10 = vsyncpa [#allocation3], 0  ;;  %s758_s0 = inlined_call_operand.hbm [shape: f32[256,128], index: 0, kind: input, shape index: {}]   ;;  %s759_s1 = inlined_call_operand.hbm [shape: f32[128,128], index: 1, kind: input, shape index: {}]   ;;  %s760_s2 = inlined_call_operand.vmem [shape: f32[1,128], index: 2, kind: input, shape index: {}]   ;;  %s761_s3 = inlined_call_operand.hbm [shape: f32[128,128], index: 3, kind: input, shape index: {}]   ;;  %s762_s4 = inlined_call_operand.vmem [shape: f32[1,128], index: 4, kind: input, shape index: {}]   ;;  %s763_s5 = inlined_call_operand.hbm [shape: f32[256,128], index: 5, kind: output, shape index: {}]  }
   0x1   :  { %11 = vsyncpa [#allocation6], 0 }
   0x2   :  { %12 = vsyncpa [#allocation4], 0  ;;  %s30_s20 = sshll.u32 %s759_s1, 4  ;;  %s624_s21 = smov [#allocation5]   ;;  %s31_s20 = int_to_ptr.hbm [resolvable:$true] %s30_s20 }
   0x3   :  { %s32_s22 = sshll.u32 %s624_s21, 4  ;;  %s17_s25 = sshll.u32 %s758_s0, 4  ;;  %s33_s22 = int_to_ptr.vmem [resolvable:$true] %s32_s22  ;;  %s18_s25 = int_to_ptr.hbm [resolvable:$true] %s17_s25 }
   0x4   :  { %s625_s26 = smov 128   ;;  %s626_s27 = smov 8  }
   0x5   :  { %38 = dma.hbm_to_vmem [thread:$0]  %s31_s20, 2048, %s33_s22, [#allocation6], %s625_s26, %s625_s26, %s626_s27  }
   0x6   :  { %s627_s28 = smov [#allocation2]   ;;  %s45_s1 = sshll.u32 %s761_s3, 4  ;;  %s46_s1 = int_to_ptr.hbm [resolvable:$true] %s45_s1 }
   0x7   :  { %s19_s29 = sshll.u32 %s627_s28, 4  ;;  %s628_s0 = smov [#allocation7]   ;;  %s20_s29 = int_to_ptr.vmem [resolvable:$true] %s19_s29 }
   0x8   :  { %25 = dma.hbm_to_vmem [thread:$0]  %s18_s25, 4096, %s20_s29, [#allocation3], %s625_s26, %s625_s26, %s626_s27  }
   0x9   :  { %s47_s7 = sshll.u32 %s628_s0, 4  ;;  %s48_s7 = int_to_ptr.vmem [resolvable:$true] %s47_s7 }
   0xa   :  { %53 = dma.hbm_to_vmem [thread:$0]  %s46_s1, 2048, %s48_s7, [#allocation6], %s625_s26, %s625_s26, %s626_s27  }
   0xb   :  { %618 = dma.done.wait [#allocation3], 4096  }
   0xc   :  { %619 = vsyncadd [#allocation3], 4294963200 }
   0xd   :  { %620 = dma.done.wait [#allocation6], 4096  }
   0xe   :  { %621 = vsyncadd [#allocation6], 4294963200  ;;  %v115_v0 = vld [vmem:[#allocation5 + $0x78] sm:$0xff]  ;;  %v114_v1 = vld [vmem:[#allocation5 + $0x70] sm:$0xff]  ;;  %s468_s13 = sshll.u32 %s763_s5, 4  ;;  %s469_s13 = int_to_ptr.hbm [resolvable:$true] %s468_s13 }
   0xf   :  { %482 = vmatpush.msra.mxu2 %v115_v0  ;;  %120 = vmatpush.msra.mxu0 %v115_v0  ;;  %v113_v2 = vld [vmem:[#allocation5 + $0x68] sm:$0xff]  ;;  %v112_v3 = vld [vmem:[#allocation5 + $0x60] sm:$0xff]  ;;  %v111_v4 = vld [vmem:[#allocation5 + $0x58] sm:$0xff] }
  0x10   :  { %v110_v5 = vld [vmem:[#allocation5 + $0x50] sm:$0xff]  ;;  %v109_v6 = vld [vmem:[#allocation5 + $0x48] sm:$0xff]  ;;  %v108_v7 = vld [vmem:[#allocation5 + $0x40] sm:$0xff] }
  0x11   :  { %483 = vmatpush.msra.mxu2 %v114_v1  ;;  %121 = vmatpush.msra.mxu0 %v114_v1  ;;  %v107_v8 = vld [vmem:[#allocation5 + $0x38] sm:$0xff]  ;;  %v106_v9 = vld [vmem:[#allocation5 + $0x30] sm:$0xff]  ;;  %v105_v10 = vld [vmem:[#allocation5 + $0x28] sm:$0xff] }
  0x12   :  { %v104_v11 = vld [vmem:[#allocation5 + $0x20] sm:$0xff]  ;;  %v103_v12 = vld [vmem:[#allocation5 + $0x18] sm:$0xff]  ;;  %v102_v13 = vld [vmem:[#allocation5 + $0x10] sm:$0xff] }
  0x13   :  { %484 = vmatpush.msra.mxu2 %v113_v2  ;;  %122 = vmatpush.msra.mxu0 %v113_v2  ;;  %v101_v14 = vld [vmem:[#allocation5 + $0x8] sm:$0xff]  ;;  %v100_v15 = vld [vmem:[#allocation5] sm:$0xff]  ;;  %v86_v20 = vld [vmem:[#allocation2 + $0x90] sm:$0xff] }
  0x14   :  { %v84_v16 = vld [vmem:[#allocation2 + $0x80] sm:$0xff]  ;;  %v85_v18 = vld [vmem:[#allocation2 + $0x88] sm:$0xff]  ;;  %v70_v21 = vld [vmem:[#allocation2 + $0x10] sm:$0xff] }
  0x15   :  { %485 = vmatpush.msra.mxu2 %v112_v3  ;;  %123 = vmatpush.msra.mxu0 %v112_v3  ;;  %v68_v17 = vld [vmem:[#allocation2] sm:$0xff]  ;;  %v69_v19 = vld [vmem:[#allocation2 + $0x8] sm:$0xff]  ;;  %v87_v22 = vld [vmem:[#allocation2 + $0x98] sm:$0xff] }
  0x16   :  { %v71_v23 = vld [vmem:[#allocation2 + $0x18] sm:$0xff]  ;;  %v88_v24 = vld [vmem:[#allocation2 + $0xa0] sm:$0xff]  ;;  %v89_v26 = vld [vmem:[#allocation2 + $0xa8] sm:$0xff] }
  0x17   :  { %486 = vmatpush.msra.mxu2 %v111_v4  ;;  %124 = vmatpush.msra.mxu0 %v111_v4  ;;  %v72_v25 = vld [vmem:[#allocation2 + $0x20] sm:$0xff]  ;;  %v73_v27 = vld [vmem:[#allocation2 + $0x28] sm:$0xff]  ;;  %v90_v28 = vld [vmem:[#allocation2 + $0xb0] sm:$0xff] }
  0x18   :  { %v74_v29 = vld [vmem:[#allocation2 + $0x30] sm:$0xff]  ;;  %v91_v30 = vld [vmem:[#allocation2 + $0xb8] sm:$0xff]  ;;  %v92_v32 = vld [vmem:[#allocation2 + $0xc0] sm:$0xff] }
  0x19   :  { %487 = vmatpush.msra.mxu2 %v110_v5  ;;  %125 = vmatpush.msra.mxu0 %v110_v5  ;;  %v75_v31 = vld [vmem:[#allocation2 + $0x38] sm:$0xff]  ;;  %v76_v33 = vld [vmem:[#allocation2 + $0x40] sm:$0xff]  ;;  %v93_v34 = vld [vmem:[#allocation2 + $0xc8] sm:$0xff] }
  0x1a   :  { %v77_v35 = vld [vmem:[#allocation2 + $0x48] sm:$0xff]  ;;  %v280_v36 = vld [vmem:[#allocation7 + $0x78] sm:$0xff]  ;;  %v279_v37 = vld [vmem:[#allocation7 + $0x70] sm:$0xff] }
  0x1b   :  { %488 = vmatpush.msra.mxu2 %v109_v6  ;;  %126 = vmatpush.msra.mxu0 %v109_v6  ;;  %v278_v38 = vld [vmem:[#allocation7 + $0x68] sm:$0xff]  ;;  %v277_v39 = vld [vmem:[#allocation7 + $0x60] sm:$0xff]  ;;  %v94_v40 = vld [vmem:[#allocation2 + $0xd0] sm:$0xff] }
  0x1c   :  { %498 = vmatpush.msra.mxu3 %v280_v36  ;;  %285 = vmatpush.msra.mxu1 %v280_v36  ;;  %v78_v41 = vld [vmem:[#allocation2 + $0x50] sm:$0xff]  ;;  %v276_v42 = vld [vmem:[#allocation7 + $0x58] sm:$0xff]  ;;  %v274_v44 = vld [vmem:[#allocation7 + $0x48] sm:$0xff] }
  0x1d   :  { %489 = vmatpush.msra.mxu2 %v108_v7  ;;  %127 = vmatpush.msra.mxu0 %v108_v7  ;;  %v275_v43 = vld [vmem:[#allocation7 + $0x50] sm:$0xff]  ;;  %v273_v45 = vld [vmem:[#allocation7 + $0x40] sm:$0xff]  ;;  %v95_v46 = vld [vmem:[#allocation2 + $0xd8] sm:$0xff] }
  0x1e   :  { %499 = vmatpush.msra.mxu3 %v279_v37  ;;  %286 = vmatpush.msra.mxu1 %v279_v37  ;;  %v79_v47 = vld [vmem:[#allocation2 + $0x58] sm:$0xff]  ;;  %v271_v49 = vld [vmem:[#allocation7 + $0x30] sm:$0xff]  ;;  %v270_v50 = vld [vmem:[#allocation7 + $0x28] sm:$0xff] }
  0x1f   :  { %490 = vmatpush.msra.mxu2 %v107_v8  ;;  %128 = vmatpush.msra.mxu0 %v107_v8  ;;  %v272_v48 = vld [vmem:[#allocation7 + $0x38] sm:$0xff]  ;;  %v269_v51 = vld [vmem:[#allocation7 + $0x20] sm:$0xff]  ;;  %v267_v55 = vld [vmem:[#allocation7 + $0x10] sm:$0xff] }
  0x20   :  { %500 = vmatpush.msra.mxu3 %v278_v38  ;;  %287 = vmatpush.msra.mxu1 %v278_v38  ;;  %v96_v52 = vld [vmem:[#allocation2 + $0xe0] sm:$0xff]  ;;  %v268_v54 = vld [vmem:[#allocation7 + $0x18] sm:$0xff]  ;;  %v266_v56 = vld [vmem:[#allocation7 + $0x8] sm:$0xff] }
  0x21   :  { %491 = vmatpush.msra.mxu2 %v106_v9  ;;  %129 = vmatpush.msra.mxu0 %v106_v9  ;;  %v80_v53 = vld [vmem:[#allocation2 + $0x60] sm:$0xff]  ;;  %v97_v57 = vld [vmem:[#allocation2 + $0xe8] sm:$0xff]  ;;  %v98_v60 = vld [vmem:[#allocation2 + $0xf0] sm:$0xff] }
  0x22   :  { %501 = vmatpush.msra.mxu3 %v277_v39  ;;  %288 = vmatpush.msra.mxu1 %v277_v39  ;;  %v81_v58 = vld [vmem:[#allocation2 + $0x68] sm:$0xff]  ;;  %v265_v59 = vld [vmem:[#allocation7] sm:$0xff]  ;;  %v82_v61 = vld [vmem:[#allocation2 + $0x70] sm:$0xff] }
  0x23   :  { %492 = vmatpush.msra.mxu2 %v105_v10  ;;  %130 = vmatpush.msra.mxu0 %v105_v10  ;;  %v99_v62 = vld [vmem:[#allocation2 + $0xf8] sm:$0xff]  ;;  %v681_v0 = vld [vmem:[%s760_s2] ss:$0 sm:$0xff] }
  0x24   :  { %502 = vmatpush.msra.mxu3 %v276_v42  ;;  %289 = vmatpush.msra.mxu1 %v276_v42  ;;  %v83_v63 = vld [vmem:[#allocation2 + $0x78] sm:$0xff] }
  0x25   :  { %493 = vmatpush.msra.mxu2 %v104_v11  ;;  %131 = vmatpush.msra.mxu0 %v104_v11 }
  0x26   :  { %503 = vmatpush.msra.mxu3 %v275_v43  ;;  %290 = vmatpush.msra.mxu1 %v275_v43 }
  0x27   :  { %494 = vmatpush.msra.mxu2 %v103_v12  ;;  %132 = vmatpush.msra.mxu0 %v103_v12 }
  0x28   :  { %504 = vmatpush.msra.mxu3 %v274_v44  ;;  %291 = vmatpush.msra.mxu1 %v274_v44 }
  0x29   :  { %495 = vmatpush.msra.mxu2 %v102_v13  ;;  %133 = vmatpush.msra.mxu0 %v102_v13 }
  0x2a   :  { %505 = vmatpush.msra.mxu3 %v273_v45  ;;  %292 = vmatpush.msra.mxu1 %v273_v45 }
  0x2b   :  { %496 = vmatpush.msra.mxu2 %v101_v14  ;;  %134 = vmatpush.msra.mxu0 %v101_v14 }
  0x2c   :  { %506 = vmatpush.msra.mxu3 %v272_v48  ;;  %293 = vmatpush.msra.mxu1 %v272_v48 }
  0x2d   :  { %497 = vmatpush.msra.mxu2 %v100_v15  ;;  %135 = vmatpush.msra.mxu0 %v100_v15 }
  0x2e   :  { %184 = vmatmul.f32.vlgmr.msra.gmra.mxu2 %v84_v16  ;;  %136 = vmatmul.f32.vlgmr.msra.gmra.mxu0 %v68_v17 }
  0x2f   :  { %507 = vmatpush.msra.mxu3 %v271_v49  ;;  %294 = vmatpush.msra.mxu1 %v271_v49 }
  0x31   :  { %508 = vmatpush.msra.mxu3 %v270_v50  ;;  %295 = vmatpush.msra.mxu1 %v270_v50 }
  0x33   :  { %509 = vmatpush.msra.mxu3 %v269_v51  ;;  %296 = vmatpush.msra.mxu1 %v269_v51 }
  0x35   :  { %510 = vmatpush.msra.mxu3 %v268_v54  ;;  %297 = vmatpush.msra.mxu1 %v268_v54 }
  0x36   :  { %187 = vmatmul.f32.gmra.mxu2 %v85_v18  ;;  %139 = vmatmul.f32.gmra.mxu0 %v69_v19 }
  0x37   :  { %511 = vmatpush.msra.mxu3 %v267_v55  ;;  %298 = vmatpush.msra.mxu1 %v267_v55 }
  0x39   :  { %512 = vmatpush.msra.mxu3 %v266_v56  ;;  %299 = vmatpush.msra.mxu1 %v266_v56 }
  0x3b   :  { %513 = vmatpush.msra.mxu3 %v265_v59  ;;  %300 = vmatpush.msra.mxu1 %v265_v59 }
  0x3e   :  { %190 = vmatmul.f32.gmra.mxu2 %v86_v20  ;;  %142 = vmatmul.f32.gmra.mxu0 %v70_v21 }
  0x46   :  { %193 = vmatmul.f32.gmra.mxu2 %v87_v22  ;;  %145 = vmatmul.f32.gmra.mxu0 %v71_v23 }
  0x4e   :  { %196 = vmatmul.f32.gmra.mxu2 %v88_v24  ;;  %148 = vmatmul.f32.gmra.mxu0 %v72_v25 }
  0x56   :  { %199 = vmatmul.f32.gmra.mxu2 %v89_v26  ;;  %151 = vmatmul.f32.gmra.mxu0 %v73_v27 }
  0x5e   :  { %202 = vmatmul.f32.gmra.mxu2 %v90_v28  ;;  %154 = vmatmul.f32.gmra.mxu0 %v74_v29 }
  0x66   :  { %205 = vmatmul.f32.gmra.mxu2 %v91_v30  ;;  %157 = vmatmul.f32.gmra.mxu0 %v75_v31 }
  0x6e   :  { %208 = vmatmul.f32.gmra.mxu2 %v92_v32  ;;  %160 = vmatmul.f32.gmra.mxu0 %v76_v33 }
  0x76   :  { %211 = vmatmul.f32.gmra.mxu2 %v93_v34  ;;  %163 = vmatmul.f32.gmra.mxu0 %v77_v35 }
  0x7e   :  { %214 = vmatmul.f32.gmra.mxu2 %v94_v40  ;;  %166 = vmatmul.f32.gmra.mxu0 %v78_v41 }
  0x86   :  { %217 = vmatmul.f32.gmra.mxu2 %v95_v46  ;;  %169 = vmatmul.f32.gmra.mxu0 %v79_v47 }
  0x8e   :  { %220 = vmatmul.f32.gmra.mxu2 %v96_v52  ;;  %172 = vmatmul.f32.gmra.mxu0 %v80_v53 }
  0x96   :  { %223 = vmatmul.f32.gmra.mxu2 %v97_v57  ;;  %175 = vmatmul.f32.gmra.mxu0 %v81_v58 }
  0x9e   :  { %226 = vmatmul.f32.gmra.mxu2 %v98_v60  ;;  %178 = vmatmul.f32.gmra.mxu0 %v82_v61 }
  0xa6   :  { %229 = vmatmul.f32.gmra.mxu2 %v99_v62  ;;  %181 = vmatmul.f32.gmra.mxu0 %v83_v63 }
  0xab   :  { %v137_v1 = vpop.f32.mrf.mxu0 }
  0xac   :  { %v138_v2 = vadd.f32 %v681_v0, %v137_v1 }
  0xae   :  { %v233_v3 = vmax.f32 %v138_v2, 0.0 }
  0xb0   :  { %301 = vmatmul.f32.vlgmr.msra.gmra.mxu1 %v233_v3 }
  0xb1   :  { %v185_v4 = vpop.f32.mrf.mxu2 }
  0xb2   :  { %v186_v5 = vadd.f32 %v681_v0, %v185_v4 }
  0xb3   :  { %v140_v6 = vpop.f32.mrf.mxu0 }
  0xb4   :  { %v249_v7 = vmax.f32 %v186_v5, 0.0  ;;  %v141_v8 = vadd.f32 %v681_v0, %v140_v6 }
  0xb6   :  { %349 = vmatmul.f32.vlgmr.msra.gmra.mxu3 %v249_v7  ;;  %v234_v9 = vmax.f32 %v141_v8, 0.0 }
  0xb8   :  { %304 = vmatmul.f32.gmra.mxu1 %v234_v9 }
  0xb9   :  { %v188_v10 = vpop.f32.mrf.mxu2 }
  0xba   :  { %v189_v11 = vadd.f32 %v681_v0, %v188_v10 }
  0xbb   :  { %v143_v12 = vpop.f32.mrf.mxu0 }
  0xbc   :  { %v250_v13 = vmax.f32 %v189_v11, 0.0  ;;  %v144_v14 = vadd.f32 %v681_v0, %v143_v12 }
  0xbe   :  { %352 = vmatmul.f32.gmra.mxu3 %v250_v13  ;;  %v235_v15 = vmax.f32 %v144_v14, 0.0 }
  0xc0   :  { %307 = vmatmul.f32.gmra.mxu1 %v235_v15 }
  0xc1   :  { %v191_v16 = vpop.f32.mrf.mxu2 }
  0xc2   :  { %v192_v17 = vadd.f32 %v681_v0, %v191_v16 }
  0xc3   :  { %v146_v18 = vpop.f32.mrf.mxu0 }
  0xc4   :  { %v251_v19 = vmax.f32 %v192_v17, 0.0  ;;  %v147_v20 = vadd.f32 %v681_v0, %v146_v18 }
  0xc6   :  { %355 = vmatmul.f32.gmra.mxu3 %v251_v19  ;;  %v236_v21 = vmax.f32 %v147_v20, 0.0 }
  0xc8   :  { %310 = vmatmul.f32.gmra.mxu1 %v236_v21 }
  0xc9   :  { %v194_v22 = vpop.f32.mrf.mxu2 }
  0xca   :  { %v195_v23 = vadd.f32 %v681_v0, %v194_v22 }
  0xcb   :  { %v149_v24 = vpop.f32.mrf.mxu0 }
  0xcc   :  { %v252_v25 = vmax.f32 %v195_v23, 0.0  ;;  %v150_v26 = vadd.f32 %v681_v0, %v149_v24 }
  0xce   :  { %358 = vmatmul.f32.gmra.mxu3 %v252_v25  ;;  %v237_v27 = vmax.f32 %v150_v26, 0.0 }
  0xd0   :  { %313 = vmatmul.f32.gmra.mxu1 %v237_v27 }
  0xd1   :  { %v197_v28 = vpop.f32.mrf.mxu2 }
  0xd2   :  { %v198_v29 = vadd.f32 %v681_v0, %v197_v28 }
  0xd3   :  { %v152_v30 = vpop.f32.mrf.mxu0 }
  0xd4   :  { %v253_v31 = vmax.f32 %v198_v29, 0.0  ;;  %v153_v32 = vadd.f32 %v681_v0, %v152_v30 }
  0xd6   :  { %361 = vmatmul.f32.gmra.mxu3 %v253_v31  ;;  %v238_v33 = vmax.f32 %v153_v32, 0.0 }
  0xd8   :  { %316 = vmatmul.f32.gmra.mxu1 %v238_v33  ;;  %v718_v33 = vld [vmem:[%s762_s4] ss:$0 sm:$0xff]  ;;  %s629_s4 = smov [#allocation8]  }
  0xd9   :  { %v200_v34 = vpop.f32.mrf.mxu2  ;;  %s466_s10 = sshll.u32 %s629_s4, 4  ;;  %s467_s10 = int_to_ptr.vmem [resolvable:$true] %s466_s10 }
  0xda   :  { %v201_v35 = vadd.f32 %v681_v0, %v200_v34 }
  0xdb   :  { %v155_v36 = vpop.f32.mrf.mxu0 }
  0xdc   :  { %v254_v37 = vmax.f32 %v201_v35, 0.0  ;;  %v156_v38 = vadd.f32 %v681_v0, %v155_v36 }
  0xde   :  { %364 = vmatmul.f32.gmra.mxu3 %v254_v37  ;;  %v239_v39 = vmax.f32 %v156_v38, 0.0 }
  0xe0   :  { %319 = vmatmul.f32.gmra.mxu1 %v239_v39 }
  0xe1   :  { %v203_v40 = vpop.f32.mrf.mxu2 }
  0xe2   :  { %v204_v41 = vadd.f32 %v681_v0, %v203_v40 }
  0xe3   :  { %v158_v42 = vpop.f32.mrf.mxu0 }
  0xe4   :  { %v255_v43 = vmax.f32 %v204_v41, 0.0  ;;  %v159_v44 = vadd.f32 %v681_v0, %v158_v42 }
  0xe6   :  { %367 = vmatmul.f32.gmra.mxu3 %v255_v43  ;;  %v240_v45 = vmax.f32 %v159_v44, 0.0 }
  0xe8   :  { %322 = vmatmul.f32.gmra.mxu1 %v240_v45 }
  0xe9   :  { %v206_v46 = vpop.f32.mrf.mxu2 }
  0xea   :  { %v207_v47 = vadd.f32 %v681_v0, %v206_v46 }
  0xeb   :  { %v161_v48 = vpop.f32.mrf.mxu0 }
  0xec   :  { %v256_v49 = vmax.f32 %v207_v47, 0.0  ;;  %v162_v50 = vadd.f32 %v681_v0, %v161_v48 }
  0xee   :  { %370 = vmatmul.f32.gmra.mxu3 %v256_v49  ;;  %v241_v51 = vmax.f32 %v162_v50, 0.0 }
  0xf0   :  { %325 = vmatmul.f32.gmra.mxu1 %v241_v51 }
  0xf1   :  { %v209_v52 = vpop.f32.mrf.mxu2 }
  0xf2   :  { %v210_v53 = vadd.f32 %v681_v0, %v209_v52 }
  0xf3   :  { %v164_v54 = vpop.f32.mrf.mxu0 }
  0xf4   :  { %v257_v55 = vmax.f32 %v210_v53, 0.0  ;;  %v165_v56 = vadd.f32 %v681_v0, %v164_v54 }
  0xf6   :  { %373 = vmatmul.f32.gmra.mxu3 %v257_v55  ;;  %v242_v57 = vmax.f32 %v165_v56, 0.0 }
  0xf8   :  { %328 = vmatmul.f32.gmra.mxu1 %v242_v57 }
  0xf9   :  { %v212_v58 = vpop.f32.mrf.mxu2 }
  0xfa   :  { %v213_v59 = vadd.f32 %v681_v0, %v212_v58 }
  0xfb   :  { %v167_v60 = vpop.f32.mrf.mxu0 }
  0xfc   :  { %v258_v61 = vmax.f32 %v213_v59, 0.0  ;;  %v168_v62 = vadd.f32 %v681_v0, %v167_v60 }
  0xfe   :  { %376 = vmatmul.f32.gmra.mxu3 %v258_v61  ;;  %v243_v63 = vmax.f32 %v168_v62, 0.0 }
 0x100   :  { %331 = vmatmul.f32.gmra.mxu1 %v243_v63 }
 0x101   :  { %v215_v1 = vpop.f32.mrf.mxu2 }
 0x102   :  { %v216_v2 = vadd.f32 %v681_v0, %v215_v1 }
 0x103   :  { %v170_v3 = vpop.f32.mrf.mxu0 }
 0x104   :  { %v259_v4 = vmax.f32 %v216_v2, 0.0  ;;  %v171_v5 = vadd.f32 %v681_v0, %v170_v3 }
 0x106   :  { %379 = vmatmul.f32.gmra.mxu3 %v259_v4  ;;  %v244_v6 = vmax.f32 %v171_v5, 0.0 }
 0x108   :  { %334 = vmatmul.f32.gmra.mxu1 %v244_v6 }
 0x109   :  { %v218_v7 = vpop.f32.mrf.mxu2 }
 0x10a   :  { %v219_v8 = vadd.f32 %v681_v0, %v218_v7 }
 0x10b   :  { %v173_v9 = vpop.f32.mrf.mxu0 }
 0x10c   :  { %v260_v10 = vmax.f32 %v219_v8, 0.0  ;;  %v174_v11 = vadd.f32 %v681_v0, %v173_v9 }
 0x10e   :  { %382 = vmatmul.f32.gmra.mxu3 %v260_v10  ;;  %v245_v12 = vmax.f32 %v174_v11, 0.0 }
 0x110   :  { %337 = vmatmul.f32.gmra.mxu1 %v245_v12 }
 0x111   :  { %v221_v13 = vpop.f32.mrf.mxu2 }
 0x112   :  { %v222_v14 = vadd.f32 %v681_v0, %v221_v13 }
 0x113   :  { %v176_v15 = vpop.f32.mrf.mxu0 }
 0x114   :  { %v261_v16 = vmax.f32 %v222_v14, 0.0  ;;  %v177_v17 = vadd.f32 %v681_v0, %v176_v15 }
 0x116   :  { %385 = vmatmul.f32.gmra.mxu3 %v261_v16  ;;  %v246_v18 = vmax.f32 %v177_v17, 0.0 }
 0x118   :  { %340 = vmatmul.f32.gmra.mxu1 %v246_v18 }
 0x119   :  { %v224_v19 = vpop.f32.mrf.mxu2 }
 0x11a   :  { %v225_v20 = vadd.f32 %v681_v0, %v224_v19 }
 0x11b   :  { %v179_v21 = vpop.f32.mrf.mxu0 }
 0x11c   :  { %v262_v22 = vmax.f32 %v225_v20, 0.0  ;;  %v180_v23 = vadd.f32 %v681_v0, %v179_v21 }
 0x11e   :  { %388 = vmatmul.f32.gmra.mxu3 %v262_v22  ;;  %v247_v24 = vmax.f32 %v180_v23, 0.0 }
 0x120   :  { %343 = vmatmul.f32.gmra.mxu1 %v247_v24 }
 0x121   :  { %v227_v25 = vpop.f32.mrf.mxu2 }
 0x122   :  { %v228_v26 = vadd.f32 %v681_v0, %v227_v25 }
 0x123   :  { %v182_v27 = vpop.f32.mrf.mxu0 }
 0x124   :  { %v263_v28 = vmax.f32 %v228_v26, 0.0  ;;  %v183_v29 = vadd.f32 %v681_v0, %v182_v27 }
 0x126   :  { %391 = vmatmul.f32.gmra.mxu3 %v263_v28  ;;  %v248_v30 = vmax.f32 %v183_v29, 0.0 }
 0x128   :  { %346 = vmatmul.f32.gmra.mxu1 %v248_v30 }
 0x129   :  { %v230_v31 = vpop.f32.mrf.mxu2 }
 0x12a   :  { %v231_v32 = vadd.f32 %v681_v0, %v230_v31 }
 0x12c   :  { %v264_v34 = vmax.f32 %v231_v32, 0.0 }
 0x12d   :  { %v302_v35 = vpop.f32.mrf.mxu1 }
 0x12e   :  { %394 = vmatmul.f32.gmra.mxu3 %v264_v34  ;;  %v303_v36 = vadd.f32 %v718_v33, %v302_v35 }
 0x130   :  { %v398_v37 = vmax.f32 %v303_v36, 0.0 }
 0x132   :  { %430 = vst [vmem:[#allocation8] sm:$0xff] %v398_v37 }
 0x135   :  { %v305_v38 = vpop.f32.mrf.mxu1 }
 0x136   :  { %v306_v39 = vadd.f32 %v718_v33, %v305_v38 }
 0x138   :  { %v399_v40 = vmax.f32 %v306_v39, 0.0 }
 0x139   :  { %v350_v41 = vpop.f32.mrf.mxu3 }
 0x13a   :  { %v351_v42 = vadd.f32 %v718_v33, %v350_v41  ;;  %431 = vst [vmem:[#allocation8 + $0x8] sm:$0xff] %v399_v40 }
 0x13c   :  { %v414_v0 = vmax.f32 %v351_v42, 0.0 }
 0x13d   :  { %v308_v43 = vpop.f32.mrf.mxu1 }
 0x13e   :  { %446 = vst [vmem:[#allocation8 + $0x80] sm:$0xff] %v414_v0  ;;  %v309_v44 = vadd.f32 %v718_v33, %v308_v43 }
 0x140   :  { %v400_v45 = vmax.f32 %v309_v44, 0.0 }
 0x141   :  { %v353_v46 = vpop.f32.mrf.mxu3 }
 0x142   :  { %v354_v47 = vadd.f32 %v718_v33, %v353_v46  ;;  %432 = vst [vmem:[#allocation8 + $0x10] sm:$0xff] %v400_v45 }
 0x144   :  { %v415_v48 = vmax.f32 %v354_v47, 0.0 }
 0x145   :  { %v311_v49 = vpop.f32.mrf.mxu1 }
 0x146   :  { %447 = vst [vmem:[#allocation8 + $0x88] sm:$0xff] %v415_v48  ;;  %v312_v50 = vadd.f32 %v718_v33, %v311_v49 }
 0x148   :  { %v401_v51 = vmax.f32 %v312_v50, 0.0 }
 0x149   :  { %v356_v52 = vpop.f32.mrf.mxu3 }
 0x14a   :  { %v357_v53 = vadd.f32 %v718_v33, %v356_v52  ;;  %433 = vst [vmem:[#allocation8 + $0x18] sm:$0xff] %v401_v51 }
 0x14c   :  { %v416_v54 = vmax.f32 %v357_v53, 0.0 }
 0x14d   :  { %v314_v55 = vpop.f32.mrf.mxu1 }
 0x14e   :  { %448 = vst [vmem:[#allocation8 + $0x90] sm:$0xff] %v416_v54  ;;  %v315_v56 = vadd.f32 %v718_v33, %v314_v55 }
 0x150   :  { %v402_v57 = vmax.f32 %v315_v56, 0.0 }
 0x151   :  { %v359_v58 = vpop.f32.mrf.mxu3 }
 0x152   :  { %v360_v59 = vadd.f32 %v718_v33, %v359_v58  ;;  %434 = vst [vmem:[#allocation8 + $0x20] sm:$0xff] %v402_v57 }
 0x154   :  { %v417_v60 = vmax.f32 %v360_v59, 0.0 }
 0x155   :  { %v317_v61 = vpop.f32.mrf.mxu1 }
 0x156   :  { %449 = vst [vmem:[#allocation8 + $0x98] sm:$0xff] %v417_v60  ;;  %v318_v62 = vadd.f32 %v718_v33, %v317_v61 }
 0x158   :  { %v403_v63 = vmax.f32 %v318_v62, 0.0 }
 0x159   :  { %v362_v1 = vpop.f32.mrf.mxu3 }
 0x15a   :  { %v363_v2 = vadd.f32 %v718_v33, %v362_v1  ;;  %435 = vst [vmem:[#allocation8 + $0x28] sm:$0xff] %v403_v63 }
 0x15c   :  { %v418_v3 = vmax.f32 %v363_v2, 0.0 }
 0x15d   :  { %v320_v4 = vpop.f32.mrf.mxu1 }
 0x15e   :  { %450 = vst [vmem:[#allocation8 + $0xa0] sm:$0xff] %v418_v3  ;;  %v321_v5 = vadd.f32 %v718_v33, %v320_v4 }
 0x160   :  { %v404_v6 = vmax.f32 %v321_v5, 0.0 }
 0x161   :  { %v365_v7 = vpop.f32.mrf.mxu3 }
 0x162   :  { %v366_v8 = vadd.f32 %v718_v33, %v365_v7  ;;  %436 = vst [vmem:[#allocation8 + $0x30] sm:$0xff] %v404_v6 }
 0x164   :  { %v419_v9 = vmax.f32 %v366_v8, 0.0 }
 0x165   :  { %v323_v10 = vpop.f32.mrf.mxu1 }
 0x166   :  { %451 = vst [vmem:[#allocation8 + $0xa8] sm:$0xff] %v419_v9  ;;  %v324_v11 = vadd.f32 %v718_v33, %v323_v10 }
 0x168   :  { %v405_v12 = vmax.f32 %v324_v11, 0.0 }
 0x169   :  { %v368_v13 = vpop.f32.mrf.mxu3 }
 0x16a   :  { %v369_v14 = vadd.f32 %v718_v33, %v368_v13  ;;  %437 = vst [vmem:[#allocation8 + $0x38] sm:$0xff] %v405_v12 }
 0x16c   :  { %v420_v15 = vmax.f32 %v369_v14, 0.0 }
 0x16d   :  { %v326_v16 = vpop.f32.mrf.mxu1 }
 0x16e   :  { %452 = vst [vmem:[#allocation8 + $0xb0] sm:$0xff] %v420_v15  ;;  %v327_v17 = vadd.f32 %v718_v33, %v326_v16 }
 0x170   :  { %v406_v18 = vmax.f32 %v327_v17, 0.0 }
 0x171   :  { %v371_v19 = vpop.f32.mrf.mxu3 }
 0x172   :  { %v372_v20 = vadd.f32 %v718_v33, %v371_v19  ;;  %438 = vst [vmem:[#allocation8 + $0x40] sm:$0xff] %v406_v18 }
 0x174   :  { %v421_v21 = vmax.f32 %v372_v20, 0.0 }
 0x175   :  { %v329_v22 = vpop.f32.mrf.mxu1 }
 0x176   :  { %453 = vst [vmem:[#allocation8 + $0xb8] sm:$0xff] %v421_v21  ;;  %v330_v23 = vadd.f32 %v718_v33, %v329_v22 }
 0x178   :  { %v407_v24 = vmax.f32 %v330_v23, 0.0 }
 0x179   :  { %v374_v25 = vpop.f32.mrf.mxu3 }
 0x17a   :  { %v375_v26 = vadd.f32 %v718_v33, %v374_v25  ;;  %439 = vst [vmem:[#allocation8 + $0x48] sm:$0xff] %v407_v24 }
 0x17c   :  { %v422_v27 = vmax.f32 %v375_v26, 0.0 }
 0x17d   :  { %v332_v28 = vpop.f32.mrf.mxu1 }
 0x17e   :  { %454 = vst [vmem:[#allocation8 + $0xc0] sm:$0xff] %v422_v27  ;;  %v333_v29 = vadd.f32 %v718_v33, %v332_v28 }
 0x180   :  { %v408_v30 = vmax.f32 %v333_v29, 0.0 }
 0x181   :  { %v377_v31 = vpop.f32.mrf.mxu3 }
 0x182   :  { %v378_v32 = vadd.f32 %v718_v33, %v377_v31  ;;  %440 = vst [vmem:[#allocation8 + $0x50] sm:$0xff] %v408_v30 }
 0x184   :  { %v423_v34 = vmax.f32 %v378_v32, 0.0 }
 0x185   :  { %v335_v35 = vpop.f32.mrf.mxu1 }
 0x186   :  { %455 = vst [vmem:[#allocation8 + $0xc8] sm:$0xff] %v423_v34  ;;  %v336_v36 = vadd.f32 %v718_v33, %v335_v35 }
 0x188   :  { %v409_v37 = vmax.f32 %v336_v36, 0.0 }
 0x189   :  { %v380_v38 = vpop.f32.mrf.mxu3 }
 0x18a   :  { %v381_v39 = vadd.f32 %v718_v33, %v380_v38  ;;  %441 = vst [vmem:[#allocation8 + $0x58] sm:$0xff] %v409_v37 }
 0x18c   :  { %v424_v40 = vmax.f32 %v381_v39, 0.0 }
 0x18d   :  { %v338_v41 = vpop.f32.mrf.mxu1 }
 0x18e   :  { %456 = vst [vmem:[#allocation8 + $0xd0] sm:$0xff] %v424_v40  ;;  %v339_v42 = vadd.f32 %v718_v33, %v338_v41 }
 0x190   :  { %v410_v0 = vmax.f32 %v339_v42, 0.0 }
 0x191   :  { %v383_v43 = vpop.f32.mrf.mxu3 }
 0x192   :  { %v384_v44 = vadd.f32 %v718_v33, %v383_v43  ;;  %442 = vst [vmem:[#allocation8 + $0x60] sm:$0xff] %v410_v0 }
 0x194   :  { %v425_v45 = vmax.f32 %v384_v44, 0.0 }
 0x195   :  { %v341_v46 = vpop.f32.mrf.mxu1 }
 0x196   :  { %457 = vst [vmem:[#allocation8 + $0xd8] sm:$0xff] %v425_v45  ;;  %v342_v47 = vadd.f32 %v718_v33, %v341_v46 }
 0x198   :  { %v411_v48 = vmax.f32 %v342_v47, 0.0 }
 0x199   :  { %v386_v49 = vpop.f32.mrf.mxu3 }
 0x19a   :  { %v387_v50 = vadd.f32 %v718_v33, %v386_v49  ;;  %443 = vst [vmem:[#allocation8 + $0x68] sm:$0xff] %v411_v48 }
 0x19c   :  { %v426_v51 = vmax.f32 %v387_v50, 0.0 }
 0x19d   :  { %v344_v52 = vpop.f32.mrf.mxu1 }
 0x19e   :  { %458 = vst [vmem:[#allocation8 + $0xe0] sm:$0xff] %v426_v51  ;;  %v345_v53 = vadd.f32 %v718_v33, %v344_v52 }
 0x1a0   :  { %v412_v54 = vmax.f32 %v345_v53, 0.0 }
 0x1a1   :  { %v389_v55 = vpop.f32.mrf.mxu3 }
 0x1a2   :  { %v390_v56 = vadd.f32 %v718_v33, %v389_v55  ;;  %444 = vst [vmem:[#allocation8 + $0x70] sm:$0xff] %v412_v54 }
 0x1a4   :  { %v427_v57 = vmax.f32 %v390_v56, 0.0 }
 0x1a5   :  { %v347_v58 = vpop.f32.mrf.mxu1 }
 0x1a6   :  { %459 = vst [vmem:[#allocation8 + $0xe8] sm:$0xff] %v427_v57  ;;  %v348_v59 = vadd.f32 %v718_v33, %v347_v58 }
 0x1a8   :  { %v413_v60 = vmax.f32 %v348_v59, 0.0 }
 0x1a9   :  { %v392_v61 = vpop.f32.mrf.mxu3 }
 0x1aa   :  { %v393_v62 = vadd.f32 %v718_v33, %v392_v61  ;;  %445 = vst [vmem:[#allocation8 + $0x78] sm:$0xff] %v413_v60 }
 0x1ac   :  { %v428_v63 = vmax.f32 %v393_v62, 0.0 }
 0x1ae   :  { %460 = vst [vmem:[#allocation8 + $0xf0] sm:$0xff] %v428_v63 }
 0x1b1   :  { %v395_v1 = vpop.f32.mrf.mxu3 }
 0x1b2   :  { %v396_v2 = vadd.f32 %v718_v33, %v395_v1 }
 0x1b4   :  { %v429_v3 = vmax.f32 %v396_v2, 0.0 }
 0x1b6   :  { %461 = vst [vmem:[#allocation8 + $0xf8] sm:$0xff] %v429_v3 }
 0x1b7   :  { %474 = dma.vmem_to_hbm [thread:$0]  %s467_s10, 4096, %s469_s13, [#allocation4], %s625_s26, %s625_s26, %s626_s27  }
 0x1b8   :  { %622 = dma.done.wait [#allocation4], 4096  }
 0x1b9   :  { %623 = vsyncadd [#allocation4], 4294963200 }
 0x1ba   :  { %479 = vsyncpa [#allocation3], 1 }
 0x1bb   :  { %480 = vsyncpa [#allocation6], 1 }
 0x1bc   :  { %481 = vsyncpa [#allocation4], 1 }

</bundles_post_ra>
